<compile_context>
chip_gen: v7x
topology: tpu7x:2x2x1
jax: 0.10.0
libtpu: 0.0.40
codegen_flags: <defaults>
</compile_context>

<pallas_src>
import functools

import jax
import jax.numpy as jnp
from jax import lax
from jax.experimental import pallas as pl
from jax.experimental.pallas import tpu as pltpu

LEAKY_SLOPE = 0.01   # nn.LeakyReLU default negative_slope
BN_EPS = 1e-5        # nn.BatchNorm1d default eps

# Set to jnp.bfloat16 on v5e (perf review): halves input HBM traffic; the conv
# matmul already runs at DEFAULT (bf16-pass) MXU precision so accuracy is
# essentially unchanged.  Kept f32 here; all post-matmul elementwise is f32.
CONV_INPUT_DTYPE = jnp.float32


def _sigmoid(x):
    # sigmoid(x) = 0.5*(1 + tanh(x/2)): keeps the transcendental on the EUP.
    return 0.5 * (jnp.tanh(0.5 * x) + 1.0)


def attention_block_kernel(x_ref, w_ref, b_ref, s_ref, o_ref,
                           *, L, K, C_in, C_out, TB):
    N = L * TB                                            # lane extent of the live signal
    x2d = x_ref[0]                                        # (C_in, Lp*TB), lane = l*TB + t

    # ---- im2col: row (k*C_in + i), col (l*TB + t) = x_padded[b, i, l + k] ----
    # Static lane-slices at offsets k*TB (128-aligned once TB >= 128).
    col = jnp.concatenate([x2d[:, k * TB:k * TB + N] for k in range(K)], axis=0)

    # ---- fused Conv1d + BatchNorm1d: ONE shared-weight matmul (DEFAULT prec) --
    y = jnp.dot(w_ref[...], col, preferred_element_type=jnp.float32)   # (C_out, N)
    y = y + b_ref[...]                                    # (C_out, 1) sublane-tile bias

    # ---- LeakyReLU ----
    y = jnp.where(y >= 0.0, y, LEAKY_SLOPE * y)
    # TODO(synk): nn.Dropout(0.1) is identity in eval mode; stochastic dropout omitted.

    # ---- CBAM ChannelGate: mean over L, 3-tap conv over C via shift-and-add ---
    m = y[:, 0:TB]
    for l in range(1, L):
        m = m + y[:, l * TB:(l + 1) * TB]
    m = m * (1.0 / L)                                     # (C_out, TB)
    zrow = jnp.zeros((1, TB), jnp.float32)
    m_prev = jnp.concatenate([zrow, m[:C_out - 1, :]], axis=0)   # m[c-1], zero pad
    m_next = jnp.concatenate([m[1:, :], zrow], axis=0)           # m[c+1], zero pad
    cm = s_ref[0] * m_prev + s_ref[1] * m + s_ref[2] * m_next + s_ref[3]
    y = y * jnp.tile(_sigmoid(cm), (1, L))                # broadcast gate over L

    # ---- CBAM SpatialGate: [mean,max] over C, 7-tap conv over L via shifts ----
    avg_c = jnp.mean(y, axis=0, keepdims=True)            # (1, N)
    max_c = jnp.max(y, axis=0, keepdims=True)             # (1, N)
    zpad = jnp.zeros((1, 3 * TB), jnp.float32)
    avgp = jnp.concatenate([zpad, avg_c, zpad], axis=1)   # (1, (L+6)*TB)
    maxp = jnp.concatenate([zpad, max_c, zpad], axis=1)
    s = None
    for j in range(7):
        term = (s_ref[4 + j] * avgp[:, j * TB:j * TB + N]
                + s_ref[11 + j] * maxp[:, j * TB:j * TB + N])
        s = term if s is None else s + term
    s = s + s_ref[18]
    y = y * _sigmoid(s)                                   # (1, N) broadcast over channels

    # ---- MaxPool1d(kernel=2, stride=2): pairwise lane-slice max ---------------
    pooled = [jnp.maximum(y[:, (2 * j) * TB:(2 * j + 1) * TB],
                          y[:, (2 * j + 1) * TB:(2 * j + 2) * TB])
              for j in range(L // 2)]
    o_ref[0] = jnp.concatenate(pooled, axis=1)            # (C_out, (L//2)*TB)


def _choose_tb(B):
    """Batch tile (lane) size.

    Lane-dense (multiple of 128) once B is large enough; capped at 1024 so the
    per-step working set stays well under v7x's 64 MiB VMEM and v5e's 16 MiB
    default scoped limit, and so >= 2 grid steps remain (v7x megacore).
    """
    if B < 256:
        return B                    # single step; blocks equal full array dims
    tb = 128
    while tb * 2 <= 1024 and -(-B // (2 * tb)) >= 2:
        tb *= 2
    return tb


def attention_block_bn(x, params):
    B, C_in, L = x.shape
    w = params["conv_w"]                         # (C_out, C_in, K), PyTorch OIH
    C_out, _, K = w.shape
    pad_l, pad_r = K // 2 - 1, K // 2            # AsymmetricPadding1d
    Lp = L + K - 1
    Lh = L // 2

    TB = _choose_tb(B)
    nsteps = -(-B // TB)
    Bp = nsteps * TB

    # ---- fold BatchNorm1d (eval mode) into the conv weights / bias ----------
    scale = params["bn_gamma"] * lax.rsqrt(params["bn_var"] + BN_EPS)
    w_fold = w * scale[:, None, None]
    b_fold = scale * (params["conv_b"] - params["bn_mean"]) + params["bn_beta"]
    # row order k*C_in + i matches the in-kernel im2col
    w2 = jnp.transpose(w_fold, (0, 2, 1)).reshape(C_out, K * C_in).astype(CONV_INPUT_DTYPE)
    fb = b_fold.reshape(C_out, 1).astype(jnp.float32)

    # ---- lane-dense input layout: (nsteps, C_in, Lp*TB), lane = l*TB + t ------
    # (the transpose/pad is one-time wrapper plumbing; batch padding is at most
    #  TB-1 rows and only when B % TB != 0 — zero for the test shapes)
    xp = jnp.pad(x, ((0, Bp - B), (0, 0), (pad_l, pad_r)))          # (Bp, C_in, Lp)
    xt = jnp.transpose(xp.reshape(nsteps, TB, C_in, Lp), (0, 2, 3, 1))
    xt = xt.reshape(nsteps, C_in, Lp * TB).astype(CONV_INPUT_DTYPE)

    # ---- pack all tiny gate parameters into one SMEM scalar vector ------------
    sg = params["sg_w"].reshape(2, 7)
    scal = jnp.concatenate([
        params["cg_w"].reshape(3), params["cg_b"].reshape(1),        # [0:3], [3]
        sg[0], sg[1],                                                # [4:11], [11:18]
        params["sg_b"].reshape(1),                                   # [18]
    ]).astype(jnp.float32)

    kernel = functools.partial(attention_block_kernel, L=L, K=K,
                               C_in=C_in, C_out=C_out, TB=TB)

    out = pl.pallas_call(
        kernel,
        out_shape=jax.ShapeDtypeStruct((nsteps, C_out, Lh * TB), jnp.float32),
        grid=(nsteps,),
        in_specs=[
            pl.BlockSpec((1, C_in, Lp * TB), lambda b: (b, 0, 0)),   # lane-dense input tile
            pl.BlockSpec((C_out, K * C_in), lambda b: (0, 0)),       # folded conv+BN weights
            pl.BlockSpec((C_out, 1), lambda b: (0, 0)),              # folded bias (sublane tile)
            pl.BlockSpec(memory_space=pltpu.MemorySpace.SMEM),       # packed gate scalars (19,)
        ],
        out_specs=pl.BlockSpec((1, C_out, Lh * TB), lambda b: (b, 0, 0)),  # lane-dense output
        compiler_params=pltpu.CompilerParams(
            dimension_semantics=("parallel",),
            vmem_limit_bytes=32 * 1024 * 1024),
    )(xt, w2, fb, scal)

    # ---- back to PyTorch NCL, drop batch padding ------------------------------
    out = jnp.transpose(out.reshape(nsteps, C_out, Lh, TB), (0, 3, 1, 2))
    out = out.reshape(Bp, C_out, Lh)
    return out[:B]


def ref_forward(x, params):
    """Pure-JAX reference matching the PyTorch forward (eval mode)."""
    w, b = params["conv_w"], params["conv_b"]
    C_out, C_in, K = w.shape
    dn = ("NCH", "OIH", "NCH")
    xp = jnp.pad(x, ((0, 0), (0, 0), (K // 2 - 1, K // 2)))
    y = lax.conv_general_dilated(xp, w, (1,), "VALID", dimension_numbers=dn,
                                 precision=lax.Precision.HIGHEST)
    y = y + b[None, :, None]
    scale = params["bn_gamma"] / jnp.sqrt(params["bn_var"] + BN_EPS)
    shift = params["bn_beta"] - params["bn_mean"] * scale
    y = y * scale[None, :, None] + shift[None, :, None]
    y = jnp.where(y >= 0, y, LEAKY_SLOPE * y)
    # channel gate
    m = jnp.transpose(jnp.mean(y, axis=2, keepdims=True), (0, 2, 1))   # (B,1,C)
    cm = lax.conv_general_dilated(m, params["cg_w"], (1,), [(1, 1)],
                                  dimension_numbers=dn,
                                  precision=lax.Precision.HIGHEST)
    cm = jnp.transpose(cm + params["cg_b"][None, :, None], (0, 2, 1))  # (B,C,1)
    y = y * jax.nn.sigmoid(cm)
    # spatial gate
    avg_ = jnp.mean(y, axis=1, keepdims=True)
    max_ = jnp.max(y, axis=1, keepdims=True)
    s_in = jnp.concatenate([avg_, max_], axis=1)                       # (B,2,L)
    sm = lax.conv_general_dilated(s_in, params["sg_w"], (1,), [(3, 3)],
                                  dimension_numbers=dn,
                                  precision=lax.Precision.HIGHEST)
    y = y * jax.nn.sigmoid(sm + params["sg_b"][None, :, None])
    # maxpool
    B, C, L = y.shape
    return jnp.max(y.reshape(B, C, L // 2, 2), axis=-1)


if __name__ == "__main__":
    key = jax.random.PRNGKey(0)
    B, C, L, K = 2, 4, 16, 16   # batch, channels, signal_size, kernel_size
    ks = jax.random.split(key, 11)
    params = {
        "conv_w": 0.2 * jax.random.normal(ks[0], (C, C, K), jnp.float32),
        "conv_b": 0.1 * jax.random.normal(ks[1], (C,), jnp.float32),
        "bn_gamma": 1.0 + 0.1 * jax.random.normal(ks[2], (C,), jnp.float32),
        "bn_beta": 0.1 * jax.random.normal(ks[3], (C,), jnp.float32),
        "bn_mean": 0.05 * jax.random.normal(ks[4], (C,), jnp.float32),
        "bn_var": 1.0 + 0.1 * jax.random.uniform(ks[5], (C,), jnp.float32),
        "cg_w": 0.5 * jax.random.normal(ks[6], (1, 1, 3), jnp.float32),   # ChannelGate Conv1d(1,1,3)
        "cg_b": 0.1 * jax.random.normal(ks[7], (1,), jnp.float32),
        "sg_w": 0.5 * jax.random.normal(ks[8], (1, 2, 7), jnp.float32),   # SpatialGate Conv1d(2,1,7)
        "sg_b": 0.1 * jax.random.normal(ks[9], (1,), jnp.float32),
    }
    x = jax.random.normal(ks[10], (B, C, L), jnp.float32)

    out = jax.block_until_ready(attention_block_bn(x, params))
    ref = jax.block_until_ready(ref_forward(x, params))

    assert out.shape == (B, C, L // 2), out.shape
    err = float(jnp.max(jnp.abs(out - ref)))
    # Only the fused conv+BN matmul is inexact (DEFAULT / bf16-pass MXU per the
    # perf review); every other stage is exact f32, so 2e-2 absolute tolerance on
    # O(1) activations is a genuine correctness check.
    if err > 2e-2:
        raise AssertionError(f"kernel/reference mismatch: max abs err = {err}")
    print("KERNEL_OK")
</pallas_src>

<mosaic_0001>
module attributes {stable_mosaic.version = 11 : i64} {
  func.func @attention_block_kernel(%arg0: i32, %arg1: memref<1x4x62xf32, #tpu.memory_space<vmem>>, %arg2: memref<4x64xf32, #tpu.memory_space<vmem>>, %arg3: memref<4x1xf32, #tpu.memory_space<vmem>>, %arg4: memref<19xf32, #tpu.memory_space<smem>>, %arg5: memref<1x4x16xf32, #tpu.memory_space<vmem>>) attributes {dimension_semantics = [#tpu.dimension_semantics<parallel>], iteration_bounds = array<i64: 1>, scalar_prefetch = 0 : i64, scratch_operands = 0 : i64, tpu.core_type = #tpu.core_type<tc>, window_params = [{transform_indices = @transform_0, window_bounds = array<i64: 1, 4, 62>}, {pipeline_mode = #tpu.pipeline_mode<synchronous>, transform_indices = @transform_1, window_bounds = array<i64: 4, 64>}, {pipeline_mode = #tpu.pipeline_mode<synchronous>, transform_indices = @transform_2, window_bounds = array<i64: 4, 1>}, {transform_indices = @transform_3, window_bounds = array<i64: 19>}, {transform_indices = @transform_4, window_bounds = array<i64: 1, 4, 16>}]} {
    %c0 = arith.constant 0 : index
    %c0_0 = arith.constant 0 : index
    %c0_1 = arith.constant 0 : index
    %0 = vector.load %arg1[%c0, %c0_0, %c0_1] : memref<1x4x62xf32, #tpu.memory_space<vmem>>, vector<1x4x62xf32>
    %1 = vector.shape_cast %0 : vector<1x4x62xf32> to vector<4x62xf32>
    %2 = vector.extract_strided_slice %1 {offsets = [0, 0], sizes = [4, 32], strides = [1, 1]} : vector<4x62xf32> to vector<4x32xf32>
    %3 = vector.extract_strided_slice %1 {offsets = [0, 2], sizes = [4, 32], strides = [1, 1]} : vector<4x62xf32> to vector<4x32xf32>
    %4 = vector.extract_strided_slice %1 {offsets = [0, 4], sizes = [4, 32], strides = [1, 1]} : vector<4x62xf32> to vector<4x32xf32>
    %5 = vector.extract_strided_slice %1 {offsets = [0, 6], sizes = [4, 32], strides = [1, 1]} : vector<4x62xf32> to vector<4x32xf32>
    %6 = vector.extract_strided_slice %1 {offsets = [0, 8], sizes = [4, 32], strides = [1, 1]} : vector<4x62xf32> to vector<4x32xf32>
    %7 = vector.extract_strided_slice %1 {offsets = [0, 10], sizes = [4, 32], strides = [1, 1]} : vector<4x62xf32> to vector<4x32xf32>
    %8 = vector.extract_strided_slice %1 {offsets = [0, 12], sizes = [4, 32], strides = [1, 1]} : vector<4x62xf32> to vector<4x32xf32>
    %9 = vector.extract_strided_slice %1 {offsets = [0, 14], sizes = [4, 32], strides = [1, 1]} : vector<4x62xf32> to vector<4x32xf32>
    %10 = vector.extract_strided_slice %1 {offsets = [0, 16], sizes = [4, 32], strides = [1, 1]} : vector<4x62xf32> to vector<4x32xf32>
    %11 = vector.extract_strided_slice %1 {offsets = [0, 18], sizes = [4, 32], strides = [1, 1]} : vector<4x62xf32> to vector<4x32xf32>
    %12 = vector.extract_strided_slice %1 {offsets = [0, 20], sizes = [4, 32], strides = [1, 1]} : vector<4x62xf32> to vector<4x32xf32>
    %13 = vector.extract_strided_slice %1 {offsets = [0, 22], sizes = [4, 32], strides = [1, 1]} : vector<4x62xf32> to vector<4x32xf32>
    %14 = vector.extract_strided_slice %1 {offsets = [0, 24], sizes = [4, 32], strides = [1, 1]} : vector<4x62xf32> to vector<4x32xf32>
    %15 = vector.extract_strided_slice %1 {offsets = [0, 26], sizes = [4, 32], strides = [1, 1]} : vector<4x62xf32> to vector<4x32xf32>
    %16 = vector.extract_strided_slice %1 {offsets = [0, 28], sizes = [4, 32], strides = [1, 1]} : vector<4x62xf32> to vector<4x32xf32>
    %17 = vector.extract_strided_slice %1 {offsets = [0, 30], sizes = [4, 32], strides = [1, 1]} : vector<4x62xf32> to vector<4x32xf32>
    %18 = tpu.concatenate %2, %3, %4, %5, %6, %7, %8, %9, %10, %11, %12, %13, %14, %15, %16, %17 in 0 : vector<4x32xf32>, vector<4x32xf32>, vector<4x32xf32>, vector<4x32xf32>, vector<4x32xf32>, vector<4x32xf32>, vector<4x32xf32>, vector<4x32xf32>, vector<4x32xf32>, vector<4x32xf32>, vector<4x32xf32>, vector<4x32xf32>, vector<4x32xf32>, vector<4x32xf32>, vector<4x32xf32>, vector<4x32xf32> -> vector<64x32xf32>
    %c0_2 = arith.constant 0 : index
    %c0_3 = arith.constant 0 : index
    %19 = vector.load %arg2[%c0_2, %c0_3] : memref<4x64xf32, #tpu.memory_space<vmem>>, vector<4x64xf32>
    %cst = arith.constant dense<0.000000e+00> : vector<4x32xf32>
    %20 = tpu.matmul %19, %18, %cst {dimension_numbers = #tpu.dot_dimension_numbers<[1], [0], [0], [1], [0, 0, 1, 1], [], []>} : vector<4x64xf32>, vector<64x32xf32>, vector<4x32xf32> -> vector<4x32xf32>
    %c0_4 = arith.constant 0 : index
    %c0_5 = arith.constant 0 : index
    %21 = vector.load %arg3[%c0_4, %c0_5] : memref<4x1xf32, #tpu.memory_space<vmem>>, vector<4x1xf32>
    %22 = vector.broadcast %21 : vector<4x1xf32> to vector<4x32xf32>
    %23 = arith.addf %20, %22 : vector<4x32xf32>
    %cst_6 = arith.constant 0.000000e+00 : f32
    %24 = vector.broadcast %cst_6 : f32 to vector<4x32xf32>
    %25 = arith.cmpf oge, %23, %24 : vector<4x32xf32>
    %cst_7 = arith.constant 0.00999999977 : f32
    %26 = vector.broadcast %cst_7 : f32 to vector<4x32xf32>
    %27 = arith.mulf %26, %23 : vector<4x32xf32>
    %28 = arith.select %25, %23, %27 : vector<4x32xi1>, vector<4x32xf32>
    %29 = vector.extract_strided_slice %28 {offsets = [0, 0], sizes = [4, 2], strides = [1, 1]} : vector<4x32xf32> to vector<4x2xf32>
    %30 = vector.extract_strided_slice %28 {offsets = [0, 2], sizes = [4, 2], strides = [1, 1]} : vector<4x32xf32> to vector<4x2xf32>
    %31 = arith.addf %29, %30 : vector<4x2xf32>
    %32 = vector.extract_strided_slice %28 {offsets = [0, 4], sizes = [4, 2], strides = [1, 1]} : vector<4x32xf32> to vector<4x2xf32>
    %33 = arith.addf %31, %32 : vector<4x2xf32>
    %34 = vector.extract_strided_slice %28 {offsets = [0, 6], sizes = [4, 2], strides = [1, 1]} : vector<4x32xf32> to vector<4x2xf32>
    %35 = arith.addf %33, %34 : vector<4x2xf32>
    %36 = vector.extract_strided_slice %28 {offsets = [0, 8], sizes = [4, 2], strides = [1, 1]} : vector<4x32xf32> to vector<4x2xf32>
    %37 = arith.addf %35, %36 : vector<4x2xf32>
    %38 = vector.extract_strided_slice %28 {offsets = [0, 10], sizes = [4, 2], strides = [1, 1]} : vector<4x32xf32> to vector<4x2xf32>
    %39 = arith.addf %37, %38 : vector<4x2xf32>
    %40 = vector.extract_strided_slice %28 {offsets = [0, 12], sizes = [4, 2], strides = [1, 1]} : vector<4x32xf32> to vector<4x2xf32>
    %41 = arith.addf %39, %40 : vector<4x2xf32>
    %42 = vector.extract_strided_slice %28 {offsets = [0, 14], sizes = [4, 2], strides = [1, 1]} : vector<4x32xf32> to vector<4x2xf32>
    %43 = arith.addf %41, %42 : vector<4x2xf32>
    %44 = vector.extract_strided_slice %28 {offsets = [0, 16], sizes = [4, 2], strides = [1, 1]} : vector<4x32xf32> to vector<4x2xf32>
    %45 = arith.addf %43, %44 : vector<4x2xf32>
    %46 = vector.extract_strided_slice %28 {offsets = [0, 18], sizes = [4, 2], strides = [1, 1]} : vector<4x32xf32> to vector<4x2xf32>
    %47 = arith.addf %45, %46 : vector<4x2xf32>
    %48 = vector.extract_strided_slice %28 {offsets = [0, 20], sizes = [4, 2], strides = [1, 1]} : vector<4x32xf32> to vector<4x2xf32>
    %49 = arith.addf %47, %48 : vector<4x2xf32>
    %50 = vector.extract_strided_slice %28 {offsets = [0, 22], sizes = [4, 2], strides = [1, 1]} : vector<4x32xf32> to vector<4x2xf32>
    %51 = arith.addf %49, %50 : vector<4x2xf32>
    %52 = vector.extract_strided_slice %28 {offsets = [0, 24], sizes = [4, 2], strides = [1, 1]} : vector<4x32xf32> to vector<4x2xf32>
    %53 = arith.addf %51, %52 : vector<4x2xf32>
    %54 = vector.extract_strided_slice %28 {offsets = [0, 26], sizes = [4, 2], strides = [1, 1]} : vector<4x32xf32> to vector<4x2xf32>
    %55 = arith.addf %53, %54 : vector<4x2xf32>
    %56 = vector.extract_strided_slice %28 {offsets = [0, 28], sizes = [4, 2], strides = [1, 1]} : vector<4x32xf32> to vector<4x2xf32>
    %57 = arith.addf %55, %56 : vector<4x2xf32>
    %58 = vector.extract_strided_slice %28 {offsets = [0, 30], sizes = [4, 2], strides = [1, 1]} : vector<4x32xf32> to vector<4x2xf32>
    %59 = arith.addf %57, %58 : vector<4x2xf32>
    %cst_8 = arith.constant 6.250000e-02 : f32
    %60 = vector.broadcast %cst_8 : f32 to vector<4x2xf32>
    %61 = arith.mulf %59, %60 : vector<4x2xf32>
    %cst_9 = arith.constant 0.000000e+00 : f32
    %62 = vector.broadcast %cst_9 : f32 to vector<1x2xf32>
    %63 = vector.extract_strided_slice %61 {offsets = [0, 0], sizes = [3, 2], strides = [1, 1]} : vector<4x2xf32> to vector<3x2xf32>
    %64 = tpu.concatenate %62, %63 in 0 : vector<1x2xf32>, vector<3x2xf32> -> vector<4x2xf32>
    %65 = vector.extract_strided_slice %61 {offsets = [1, 0], sizes = [3, 2], strides = [1, 1]} : vector<4x2xf32> to vector<3x2xf32>
    %66 = tpu.concatenate %65, %62 in 0 : vector<3x2xf32>, vector<1x2xf32> -> vector<4x2xf32>
    %c0_10 = arith.constant 0 : index
    %67 = memref.load %arg4[%c0_10] : memref<19xf32, #tpu.memory_space<smem>>
    %68 = vector.broadcast %67 : f32 to vector<4x2xf32>
    %69 = arith.mulf %68, %64 : vector<4x2xf32>
    %c1 = arith.constant 1 : index
    %70 = memref.load %arg4[%c1] : memref<19xf32, #tpu.memory_space<smem>>
    %71 = vector.broadcast %70 : f32 to vector<4x2xf32>
    %72 = arith.mulf %71, %61 : vector<4x2xf32>
    %73 = arith.addf %69, %72 : vector<4x2xf32>
    %c2 = arith.constant 2 : index
    %74 = memref.load %arg4[%c2] : memref<19xf32, #tpu.memory_space<smem>>
    %75 = vector.broadcast %74 : f32 to vector<4x2xf32>
    %76 = arith.mulf %75, %66 : vector<4x2xf32>
    %77 = arith.addf %73, %76 : vector<4x2xf32>
    %c3 = arith.constant 3 : index
    %78 = memref.load %arg4[%c3] : memref<19xf32, #tpu.memory_space<smem>>
    %79 = vector.broadcast %78 : f32 to vector<4x2xf32>
    %80 = arith.addf %77, %79 : vector<4x2xf32>
    %cst_11 = arith.constant 5.000000e-01 : f32
    %81 = vector.broadcast %cst_11 : f32 to vector<4x2xf32>
    %82 = arith.mulf %81, %80 : vector<4x2xf32>
    %83 = math.tanh %82 : vector<4x2xf32>
    %cst_12 = arith.constant 1.000000e+00 : f32
    %84 = vector.broadcast %cst_12 : f32 to vector<4x2xf32>
    %85 = arith.addf %83, %84 : vector<4x2xf32>
    %cst_13 = arith.constant 5.000000e-01 : f32
    %86 = vector.broadcast %cst_13 : f32 to vector<4x2xf32>
    %87 = arith.mulf %86, %85 : vector<4x2xf32>
    %88 = tpu.concatenate %87, %87, %87, %87, %87, %87, %87, %87, %87, %87, %87, %87, %87, %87, %87, %87 in 1 : vector<4x2xf32>, vector<4x2xf32>, vector<4x2xf32>, vector<4x2xf32>, vector<4x2xf32>, vector<4x2xf32>, vector<4x2xf32>, vector<4x2xf32>, vector<4x2xf32>, vector<4x2xf32>, vector<4x2xf32>, vector<4x2xf32>, vector<4x2xf32>, vector<4x2xf32>, vector<4x2xf32>, vector<4x2xf32> -> vector<4x32xf32>
    %89 = arith.mulf %28, %88 : vector<4x32xf32>
    %cst_14 = arith.constant dense<0.000000e+00> : vector<32xf32>
    %90 = vector.multi_reduction <add>, %89, %cst_14 [0] : vector<4x32xf32> to vector<32xf32>
    %91 = vector.shape_cast %90 : vector<32xf32> to vector<1x32xf32>
    %cst_15 = arith.constant 4.000000e+00 : f32
    %92 = vector.broadcast %cst_15 : f32 to vector<1x32xf32>
    %93 = arith.divf %91, %92 : vector<1x32xf32>
    %cst_16 = arith.constant dense<0xFF800000> : vector<32xf32>
    %94 = vector.multi_reduction <maximumf>, %89, %cst_16 [0] : vector<4x32xf32> to vector<32xf32>
    %95 = vector.shape_cast %94 : vector<32xf32> to vector<1x32xf32>
    %cst_17 = arith.constant 0.000000e+00 : f32
    %96 = vector.broadcast %cst_17 : f32 to vector<1x6xf32>
    %97 = tpu.concatenate %96, %93, %96 in 1 : vector<1x6xf32>, vector<1x32xf32>, vector<1x6xf32> -> vector<1x44xf32>
    %98 = tpu.concatenate %96, %95, %96 in 1 : vector<1x6xf32>, vector<1x32xf32>, vector<1x6xf32> -> vector<1x44xf32>
    %c4 = arith.constant 4 : index
    %99 = memref.load %arg4[%c4] : memref<19xf32, #tpu.memory_space<smem>>
    %100 = vector.extract_strided_slice %97 {offsets = [0, 0], sizes = [1, 32], strides = [1, 1]} : vector<1x44xf32> to vector<1x32xf32>
    %101 = vector.broadcast %99 : f32 to vector<1x32xf32>
    %102 = arith.mulf %101, %100 : vector<1x32xf32>
    %c11 = arith.constant 11 : index
    %103 = memref.load %arg4[%c11] : memref<19xf32, #tpu.memory_space<smem>>
    %104 = vector.extract_strided_slice %98 {offsets = [0, 0], sizes = [1, 32], strides = [1, 1]} : vector<1x44xf32> to vector<1x32xf32>
    %105 = vector.broadcast %103 : f32 to vector<1x32xf32>
    %106 = arith.mulf %105, %104 : vector<1x32xf32>
    %107 = arith.addf %102, %106 : vector<1x32xf32>
    %c5 = arith.constant 5 : index
    %108 = memref.load %arg4[%c5] : memref<19xf32, #tpu.memory_space<smem>>
    %109 = vector.extract_strided_slice %97 {offsets = [0, 2], sizes = [1, 32], strides = [1, 1]} : vector<1x44xf32> to vector<1x32xf32>
    %110 = vector.broadcast %108 : f32 to vector<1x32xf32>
    %111 = arith.mulf %110, %109 : vector<1x32xf32>
    %c12 = arith.constant 12 : index
    %112 = memref.load %arg4[%c12] : memref<19xf32, #tpu.memory_space<smem>>
    %113 = vector.extract_strided_slice %98 {offsets = [0, 2], sizes = [1, 32], strides = [1, 1]} : vector<1x44xf32> to vector<1x32xf32>
    %114 = vector.broadcast %112 : f32 to vector<1x32xf32>
    %115 = arith.mulf %114, %113 : vector<1x32xf32>
    %116 = arith.addf %111, %115 : vector<1x32xf32>
    %117 = arith.addf %107, %116 : vector<1x32xf32>
    %c6 = arith.constant 6 : index
    %118 = memref.load %arg4[%c6] : memref<19xf32, #tpu.memory_space<smem>>
    %119 = vector.extract_strided_slice %97 {offsets = [0, 4], sizes = [1, 32], strides = [1, 1]} : vector<1x44xf32> to vector<1x32xf32>
    %120 = vector.broadcast %118 : f32 to vector<1x32xf32>
    %121 = arith.mulf %120, %119 : vector<1x32xf32>
    %c13 = arith.constant 13 : index
    %122 = memref.load %arg4[%c13] : memref<19xf32, #tpu.memory_space<smem>>
    %123 = vector.extract_strided_slice %98 {offsets = [0, 4], sizes = [1, 32], strides = [1, 1]} : vector<1x44xf32> to vector<1x32xf32>
    %124 = vector.broadcast %122 : f32 to vector<1x32xf32>
    %125 = arith.mulf %124, %123 : vector<1x32xf32>
    %126 = arith.addf %121, %125 : vector<1x32xf32>
    %127 = arith.addf %117, %126 : vector<1x32xf32>
    %c7 = arith.constant 7 : index
    %128 = memref.load %arg4[%c7] : memref<19xf32, #tpu.memory_space<smem>>
    %129 = vector.extract_strided_slice %97 {offsets = [0, 6], sizes = [1, 32], strides = [1, 1]} : vector<1x44xf32> to vector<1x32xf32>
    %130 = vector.broadcast %128 : f32 to vector<1x32xf32>
    %131 = arith.mulf %130, %129 : vector<1x32xf32>
    %c14 = arith.constant 14 : index
    %132 = memref.load %arg4[%c14] : memref<19xf32, #tpu.memory_space<smem>>
    %133 = vector.extract_strided_slice %98 {offsets = [0, 6], sizes = [1, 32], strides = [1, 1]} : vector<1x44xf32> to vector<1x32xf32>
    %134 = vector.broadcast %132 : f32 to vector<1x32xf32>
    %135 = arith.mulf %134, %133 : vector<1x32xf32>
    %136 = arith.addf %131, %135 : vector<1x32xf32>
    %137 = arith.addf %127, %136 : vector<1x32xf32>
    %c8 = arith.constant 8 : index
    %138 = memref.load %arg4[%c8] : memref<19xf32, #tpu.memory_space<smem>>
    %139 = vector.extract_strided_slice %97 {offsets = [0, 8], sizes = [1, 32], strides = [1, 1]} : vector<1x44xf32> to vector<1x32xf32>
    %140 = vector.broadcast %138 : f32 to vector<1x32xf32>
    %141 = arith.mulf %140, %139 : vector<1x32xf32>
    %c15 = arith.constant 15 : index
    %142 = memref.load %arg4[%c15] : memref<19xf32, #tpu.memory_space<smem>>
    %143 = vector.extract_strided_slice %98 {offsets = [0, 8], sizes = [1, 32], strides = [1, 1]} : vector<1x44xf32> to vector<1x32xf32>
    %144 = vector.broadcast %142 : f32 to vector<1x32xf32>
    %145 = arith.mulf %144, %143 : vector<1x32xf32>
    %146 = arith.addf %141, %145 : vector<1x32xf32>
    %147 = arith.addf %137, %146 : vector<1x32xf32>
    %c9 = arith.constant 9 : index
    %148 = memref.load %arg4[%c9] : memref<19xf32, #tpu.memory_space<smem>>
    %149 = vector.extract_strided_slice %97 {offsets = [0, 10], sizes = [1, 32], strides = [1, 1]} : vector<1x44xf32> to vector<1x32xf32>
    %150 = vector.broadcast %148 : f32 to vector<1x32xf32>
    %151 = arith.mulf %150, %149 : vector<1x32xf32>
    %c16 = arith.constant 16 : index
    %152 = memref.load %arg4[%c16] : memref<19xf32, #tpu.memory_space<smem>>
    %153 = vector.extract_strided_slice %98 {offsets = [0, 10], sizes = [1, 32], strides = [1, 1]} : vector<1x44xf32> to vector<1x32xf32>
    %154 = vector.broadcast %152 : f32 to vector<1x32xf32>
    %155 = arith.mulf %154, %153 : vector<1x32xf32>
    %156 = arith.addf %151, %155 : vector<1x32xf32>
    %157 = arith.addf %147, %156 : vector<1x32xf32>
    %c10 = arith.constant 10 : index
    %158 = memref.load %arg4[%c10] : memref<19xf32, #tpu.memory_space<smem>>
    %159 = vector.extract_strided_slice %97 {offsets = [0, 12], sizes = [1, 32], strides = [1, 1]} : vector<1x44xf32> to vector<1x32xf32>
    %160 = vector.broadcast %158 : f32 to vector<1x32xf32>
    %161 = arith.mulf %160, %159 : vector<1x32xf32>
    %c17 = arith.constant 17 : index
    %162 = memref.load %arg4[%c17] : memref<19xf32, #tpu.memory_space<smem>>
    %163 = vector.extract_strided_slice %98 {offsets = [0, 12], sizes = [1, 32], strides = [1, 1]} : vector<1x44xf32> to vector<1x32xf32>
    %164 = vector.broadcast %162 : f32 to vector<1x32xf32>
    %165 = arith.mulf %164, %163 : vector<1x32xf32>
    %166 = arith.addf %161, %165 : vector<1x32xf32>
    %167 = arith.addf %157, %166 : vector<1x32xf32>
    %c18 = arith.constant 18 : index
    %168 = memref.load %arg4[%c18] : memref<19xf32, #tpu.memory_space<smem>>
    %169 = vector.broadcast %168 : f32 to vector<1x32xf32>
    %170 = arith.addf %167, %169 : vector<1x32xf32>
    %cst_18 = arith.constant 5.000000e-01 : f32
    %171 = vector.broadcast %cst_18 : f32 to vector<1x32xf32>
    %172 = arith.mulf %171, %170 : vector<1x32xf32>
    %173 = math.tanh %172 : vector<1x32xf32>
    %cst_19 = arith.constant 1.000000e+00 : f32
    %174 = vector.broadcast %cst_19 : f32 to vector<1x32xf32>
    %175 = arith.addf %173, %174 : vector<1x32xf32>
    %cst_20 = arith.constant 5.000000e-01 : f32
    %176 = vector.broadcast %cst_20 : f32 to vector<1x32xf32>
    %177 = arith.mulf %176, %175 : vector<1x32xf32>
    %178 = vector.broadcast %177 : vector<1x32xf32> to vector<4x32xf32>
    %179 = arith.mulf %89, %178 : vector<4x32xf32>
    %180 = vector.extract_strided_slice %179 {offsets = [0, 0], sizes = [4, 2], strides = [1, 1]} : vector<4x32xf32> to vector<4x2xf32>
    %181 = vector.extract_strided_slice %179 {offsets = [0, 2], sizes = [4, 2], strides = [1, 1]} : vector<4x32xf32> to vector<4x2xf32>
    %182 = arith.maximumf %180, %181 : vector<4x2xf32>
    %183 = vector.extract_strided_slice %179 {offsets = [0, 4], sizes = [4, 2], strides = [1, 1]} : vector<4x32xf32> to vector<4x2xf32>
    %184 = vector.extract_strided_slice %179 {offsets = [0, 6], sizes = [4, 2], strides = [1, 1]} : vector<4x32xf32> to vector<4x2xf32>
    %185 = arith.maximumf %183, %184 : vector<4x2xf32>
    %186 = vector.extract_strided_slice %179 {offsets = [0, 8], sizes = [4, 2], strides = [1, 1]} : vector<4x32xf32> to vector<4x2xf32>
    %187 = vector.extract_strided_slice %179 {offsets = [0, 10], sizes = [4, 2], strides = [1, 1]} : vector<4x32xf32> to vector<4x2xf32>
    %188 = arith.maximumf %186, %187 : vector<4x2xf32>
    %189 = vector.extract_strided_slice %179 {offsets = [0, 12], sizes = [4, 2], strides = [1, 1]} : vector<4x32xf32> to vector<4x2xf32>
    %190 = vector.extract_strided_slice %179 {offsets = [0, 14], sizes = [4, 2], strides = [1, 1]} : vector<4x32xf32> to vector<4x2xf32>
    %191 = arith.maximumf %189, %190 : vector<4x2xf32>
    %192 = vector.extract_strided_slice %179 {offsets = [0, 16], sizes = [4, 2], strides = [1, 1]} : vector<4x32xf32> to vector<4x2xf32>
    %193 = vector.extract_strided_slice %179 {offsets = [0, 18], sizes = [4, 2], strides = [1, 1]} : vector<4x32xf32> to vector<4x2xf32>
    %194 = arith.maximumf %192, %193 : vector<4x2xf32>
    %195 = vector.extract_strided_slice %179 {offsets = [0, 20], sizes = [4, 2], strides = [1, 1]} : vector<4x32xf32> to vector<4x2xf32>
    %196 = vector.extract_strided_slice %179 {offsets = [0, 22], sizes = [4, 2], strides = [1, 1]} : vector<4x32xf32> to vector<4x2xf32>
    %197 = arith.maximumf %195, %196 : vector<4x2xf32>
    %198 = vector.extract_strided_slice %179 {offsets = [0, 24], sizes = [4, 2], strides = [1, 1]} : vector<4x32xf32> to vector<4x2xf32>
    %199 = vector.extract_strided_slice %179 {offsets = [0, 26], sizes = [4, 2], strides = [1, 1]} : vector<4x32xf32> to vector<4x2xf32>
    %200 = arith.maximumf %198, %199 : vector<4x2xf32>
    %201 = vector.extract_strided_slice %179 {offsets = [0, 28], sizes = [4, 2], strides = [1, 1]} : vector<4x32xf32> to vector<4x2xf32>
    %202 = vector.extract_strided_slice %179 {offsets = [0, 30], sizes = [4, 2], strides = [1, 1]} : vector<4x32xf32> to vector<4x2xf32>
    %203 = arith.maximumf %201, %202 : vector<4x2xf32>
    %204 = tpu.concatenate %182, %185, %188, %191, %194, %197, %200, %203 in 1 : vector<4x2xf32>, vector<4x2xf32>, vector<4x2xf32>, vector<4x2xf32>, vector<4x2xf32>, vector<4x2xf32>, vector<4x2xf32>, vector<4x2xf32> -> vector<4x16xf32>
    %c0_21 = arith.constant 0 : index
    %c0_22 = arith.constant 0 : index
    %c0_23 = arith.constant 0 : index
    %205 = vector.load %arg5[%c0_21, %c0_22, %c0_23] : memref<1x4x16xf32, #tpu.memory_space<vmem>>, vector<1x4x16xf32>
    %206 = vector.shape_cast %205 : vector<1x4x16xf32> to vector<4x16xf32>
    %207 = vector.shape_cast %204 : vector<4x16xf32> to vector<1x4x16xf32>
    tpu.vector_store %arg5[%c0_21, %c0_22, %c0_23], %207 {strides = array<i32>} : memref<1x4x16xf32, #tpu.memory_space<vmem>>, vector<1x4x16xf32>,
    return
  }
  func.func @transform_0(%arg0: i32) -> (i32, i32, i32) {
    %c0_i32 = arith.constant 0 : i32
    %c0_i32_0 = arith.constant 0 : i32
    %c0_i32_1 = arith.constant 0 : i32
    return %arg0, %c0_i32, %c0_i32_0 : i32, i32, i32
  }
  func.func @transform_1(%arg0: i32) -> (i32, i32) {
    %c0_i32 = arith.constant 0 : i32
    %c0_i32_0 = arith.constant 0 : i32
    %c0_i32_1 = arith.constant 0 : i32
    return %c0_i32, %c0_i32_0 : i32, i32
  }
  func.func @transform_2(%arg0: i32) -> (i32, i32) {
    %c0_i32 = arith.constant 0 : i32
    %c0_i32_0 = arith.constant 0 : i32
    %c0_i32_1 = arith.constant 0 : i32
    return %c0_i32, %c0_i32_0 : i32, i32
  }
  func.func @transform_3(%arg0: i32) -> i32 {
    %c0_i32 = arith.constant 0 : i32
    %c0_i32_0 = arith.constant 0 : i32
    return %c0_i32 : i32
  }
  func.func @transform_4(%arg0: i32) -> (i32, i32, i32) {
    %c0_i32 = arith.constant 0 : i32
    %c0_i32_0 = arith.constant 0 : i32
    %c0_i32_1 = arith.constant 0 : i32
    return %arg0, %c0_i32, %c0_i32_0 : i32, i32, i32
  }
}

</mosaic_0001>

<bundles_post_ra>
// kernel: tpu_custom_call.1
= control target key start
LH: loop header
LB: loop body
LE: loop exit
PB: predicated region body
PF: predicated region fallthrough
CT: control target
= control target key end

     0   :  { %9 = vsyncpa [#allocation4], 0  ;;  %s868_s0 = inlined_call_operand.vmem [shape: f32[1,4,62], index: 0, kind: input, shape index: {}]   ;;  %s869_s1 = inlined_call_operand.vmem [shape: f32[4,64], index: 1, kind: input, shape index: {}]   ;;  %s870_s2 = inlined_call_operand.vmem [shape: f32[4,1], index: 2, kind: input, shape index: {}]   ;;  %s871_s3 = inlined_call_operand.vmem [shape: f32[19], index: 3, kind: input, shape index: {}]   ;;  %s872_s4 = inlined_call_operand.hbm [shape: f32[1,4,16], index: 4, kind: output, shape index: {}]  }
   0x1   :  { %10 = vsyncpa [#allocation3], 0  ;;  %s23_s17 = sshll.u32 %s871_s3, 4  ;;  %s24_s17 = int_to_ptr.vmem [resolvable:$true] %s23_s17 }
   0x2   :  { %s611_s18 = scalar_lea.vmem %s24_s17, 16  ;;  %p616_p1 = scmp.lt.s32.totalorder %s24_s17, %s24_s17 }
   0x3   :  { %p612_p0 = scmp.ne.s32.totalorder %s24_s17, %s611_s18  ;;  %p617_p2 = scmp.lt.s32.totalorder %s611_s18, %s611_s18 }
   0x5   :  { %p618_p3 = por %p617_p2, %p616_p1 }
   0x7   :  { %p619_p4 = pnand %p618_p3, %p612_p0 }
   0x9   :  { %622 = shalt.err (!%p619_p4)
}
   0xa   :  { %s649_s19 = smov [#allocation2]  }
   0xb   :  { %26 = dma.vmem_to_smem %s24_s17, 16, %s649_s19, [#allocation4]  }
   0xc   :  { %645 = dma.done.wait [#allocation4], 16  }
   0xd   :  { %646 = vsyncadd [#allocation4], 4294967280 }
   0xe   :  { %30 = sfence }
   0xf   :  { %v31_v0 = vld [vmem:[%s868_s0] sm:$0xf]  ;;  %v650_v2 = vmov 0.0|0.0   ;;  %s651_s3 = smov 126   ;;  %s652_s22 = smov 122   ;;  %vm661_vm0 = vmmov 0  }
  0x10   :  { %v33_v1 = vrot.slane %v31_v0, 4  ;;  %557 = vmatprep.subr.bf16.mxu0 %v650_v2  ;;  %s653_s23 = smov 124   ;;  %s654_s24 = smov 120   ;;  %v662_v3 = vmov 0.0   ;;  %v665_v4 = vmov 0   ;;  %vm79_vm1 = vcmask 1043456  }
  0x11   :  { %s655_s25 = smov 118   ;;  %s656_s0 = smov 116   ;;  %554 = vmatprep.mubr.msk.f32.mxu0 %vm661_vm0, %v662_v3  ;;  %605 = vset.pattern.permute.xlu1 %v665_v4  ;;  %v89_v5 = vld [vmem:[%s870_s2] sm:$0xf]  ;;  %vm95_vm2 = vcmask 523264   ;;  %vm237_vm4 = vcmask 1040384  }
  0x12   :  { %34 = vrot.lane.b32.xlu0 %v33_v1, %s651_s3  ;;  %40 = vrot.lane.b32.xlu1 %v33_v1, %s652_s22  ;;  %s657_s26 = smov 114   ;;  %s658_s27 = smov 112   ;;  %v88_v33 = vld [vmem:[%s869_s1] sm:$0xf]  ;;  %vm241_vm5 = vcmask 1042432   ;;  %vm307_vm6 = vcmask 15360  }
  0x13   :  { %s659_s28 = smov 110   ;;  %s660_s29 = smov 108   ;;  %606 = vset.pattern.permute.xlu0 %v665_v4  ;;  %vm309_vm7 = vcmask 31744   ;;  %vm311_vm8 = vcmask 48128   ;;  %vm313_vm9 = vcmask 64512   ;;  %vm315_vm10 = vcmask 80896  }
  0x14   :  { %s663_s30 = smov 106   ;;  %s664_s5 = smov 104   ;;  %vm317_vm11 = vcmask 97280   ;;  %vm319_vm12 = vcmask 113664   ;;  %vm321_vm13 = vcmask 130048   ;;  %vm323_vm14 = vcmask 146432  }
  0x15   :  { %s666_s6 = smov 102   ;;  %s667_s7 = smov 100   ;;  %vm325_vm15 = vcmask 162816   ;;  %vm327_vm0 = vcmask 179200  }
  0x16   :  { %37 = vrot.lane.b32.xlu0 %v31_v0, %s653_s23  ;;  %43 = vrot.lane.b32.xlu1 %v31_v0, %s654_s24  ;;  %s668_s10 = smov 98   ;;  %s243_s1 = sld [smem:[#allocation2]] }
  0x17   :  { %s511_s12 = sld [smem:[#allocation2 + $0x1]]  ;;  %s512_s13 = sld [smem:[#allocation2 + $0x2]] }
  0x18   :  { %s513_s14 = sld [smem:[#allocation2 + $0x3]]  ;;  %s669_s15 = smov 4  }
  0x19   :  { %s670_s16 = smov 2   ;;  %s671_s17 = smov 8  }
  0x1a   :  { %46 = vrot.lane.b32.xlu0 %v33_v1, %s655_s25  ;;  %49 = vrot.lane.b32.xlu1 %v31_v0, %s656_s0  ;;  %s672_s18 = smov 6   ;;  %s673_s19 = smov 12  }
  0x1b   :  { %s674_s20 = smov 10   ;;  %s675_s21 = smov 16  }
  0x1c   :  { %s683_s8 = smov 30   ;;  %s519_s9 = sld [smem:[#allocation2 + $0xd]] }
  0x1d   :  { %s518_s2 = sld [smem:[#allocation2 + $0x6]]  ;;  %s516_s11 = sld [smem:[#allocation2 + $0x5]] }
  0x1e   :  { %52 = vrot.lane.b32.xlu0 %v33_v1, %s657_s26  ;;  %55 = vrot.lane.b32.xlu1 %v31_v0, %s658_s27 }
  0x22   :  { %58 = vrot.lane.b32.xlu0 %v33_v1, %s659_s28  ;;  %61 = vrot.lane.b32.xlu1 %v31_v0, %s660_s29 }
  0x26   :  { %64 = vrot.lane.b32.xlu0 %v33_v1, %s663_s30  ;;  %67 = vrot.lane.b32.xlu1 %v31_v0, %s664_s5 }
  0x2a   :  { %70 = vrot.lane.b32.xlu0 %v33_v1, %s666_s6  ;;  %73 = vrot.lane.b32.xlu1 %v31_v0, %s667_s7 }
  0x2e   :  { %76 = vrot.lane.b32.xlu0 %v33_v1, %s668_s10  ;;  %92 = vperm.xlu1 %605, %v89_v5  }
  0x84   :  { %v35_v6 = vpop.permute.xlu0 %34  ;;  %v41_v7 = vpop.permute.xlu1 %40 }
  0x85   :  { %v80_v10 = vsel %vm79_vm1, %v31_v0, %v35_v6 }
  0x88   :  { %v38_v8 = vpop.permute.xlu0 %37  ;;  %v44_v9 = vpop.permute.xlu1 %43 }
  0x89   :  { %v81_v11 = vsel %vm79_vm1, %v38_v8, %v41_v7  ;;  %v244_v7 = vstv %s243_s1  ;;  %v247_v8 = vstv %s511_s12  ;;  %s799_s1 = sld [smem:[#allocation2 + $0x4]]  ;;  %s801_s12 = sld [smem:[#allocation2 + $0xb]] }
  0x8a   :  { %v558_v12 = vpack.c.bf16 %v81_v11, %v80_v10  ;;  %v251_v11 = vstv %s512_s13  ;;  %s803_s13 = sld [smem:[#allocation2 + $0x8]] }
  0x8c   :  { %559 = vmatpush3.bf16.msra.mxu0 %v558_v12  ;;  %v47_v13 = vpop.permute.xlu0 %46  ;;  %v50_v14 = vpop.permute.xlu1 %49 }
  0x8d   :  { %560 = vmatprep.subr.bf16.mxu0 %v650_v2  ;;  %v82_v17 = vsel %vm79_vm1, %v44_v9, %v47_v13 }
  0x90   :  { %v53_v15 = vpop.permute.xlu0 %52  ;;  %v56_v16 = vpop.permute.xlu1 %55 }
  0x91   :  { %v83_v18 = vsel %vm79_vm1, %v50_v14, %v53_v15 }
  0x92   :  { %v561_v19 = vpack.c.bf16 %v83_v18, %v82_v17  ;;  %v255_v18 = vstv %s513_s14  ;;  %s805_s14 = sld [smem:[#allocation2 + $0x7]] }
  0x94   :  { %562 = vmatpush3.bf16.msra.mxu0 %v561_v19  ;;  %v59_v20 = vpop.permute.xlu0 %58  ;;  %v62_v21 = vpop.permute.xlu1 %61 }
  0x95   :  { %563 = vmatprep.subr.bf16.mxu0 %v650_v2  ;;  %v84_v24 = vsel %vm79_vm1, %v56_v16, %v59_v20 }
  0x98   :  { %v65_v22 = vpop.permute.xlu0 %64  ;;  %v68_v23 = vpop.permute.xlu1 %67 }
  0x99   :  { %v85_v25 = vsel %vm79_vm1, %v62_v21, %v65_v22 }
  0x9a   :  { %v564_v26 = vpack.c.bf16 %v85_v25, %v84_v24 }
  0x9c   :  { %565 = vmatpush3.bf16.msra.mxu0 %v564_v26  ;;  %v71_v27 = vpop.permute.xlu0 %70  ;;  %v74_v28 = vpop.permute.xlu1 %73 }
  0x9d   :  { %566 = vmatprep.subr.bf16.mxu0 %v650_v2  ;;  %v86_v30 = vsel %vm79_vm1, %v68_v23, %v71_v27 }
  0xa0   :  { %v77_v29 = vpop.permute.xlu0 %76 }
  0xa1   :  { %v87_v31 = vsel %vm79_vm1, %v74_v28, %v77_v29  ;;  %vm329_vm1 = vcmask 195584  }
  0xa2   :  { %v567_v32 = vpack.c.bf16 %v87_v31, %v86_v30 }
  0xa4   :  { %568 = vmatpush3.bf16.msra.mxu0 %v567_v32 }
  0xa7   :  { %555 = vmatmul.mubr.msk.f32.vlgmr.msra.gmra.mrb[0].mxu0 %vm95_vm2, %v88_v33  ;;  %vm331_vm2 = vcmask 211968  }
  0xad   :  { %v93_v34 = vpop.permute.xlu1 %92 }
 0x17a   :  { %v165_v35 = vpop.f32.mrb[0].mxu0 }
 0x17b   :  { %v166_v36 = vadd.f32 %v165_v35, %v93_v34  ;;  %v556_v37 = vpop.f32.mrb[1].mxu0 }
 0x17d   :  { %vm169_vm3 = vcmp.ge.f32.partialorder %v166_v36, 0.0  ;;  %v170_v38 = vmul.f32 0.01, %v166_v36 }
 0x17f   :  { %v749_v39 = vsel %vm169_vm3, %v166_v36, %v170_v38  ;;  %vm333_vm3 = vcmask 228352  }
 0x180   :  { %177 = vrot.lane.b32.xlu1 %v749_v39, %s653_s23  ;;  %173 = vrot.lane.b32.xlu0 %v749_v39, %s651_s3 }
 0x184   :  { %185 = vrot.lane.b32.xlu1 %v749_v39, %s654_s24  ;;  %181 = vrot.lane.b32.xlu0 %v749_v39, %s652_s22 }
 0x188   :  { %193 = vrot.lane.b32.xlu1 %v749_v39, %s656_s0  ;;  %189 = vrot.lane.b32.xlu0 %v749_v39, %s655_s25 }
 0x18c   :  { %201 = vrot.lane.b32.xlu1 %v749_v39, %s658_s27  ;;  %197 = vrot.lane.b32.xlu0 %v749_v39, %s657_s26  ;;  %s676_s27 = smov 14  }
 0x190   :  { %209 = vrot.lane.b32.xlu1 %v749_v39, %s660_s29  ;;  %205 = vrot.lane.b32.xlu0 %v749_v39, %s659_s28  ;;  %s677_s28 = smov 20   ;;  %s678_s29 = smov 18  }
 0x194   :  { %217 = vrot.lane.b32.xlu1 %v749_v39, %s664_s5  ;;  %213 = vrot.lane.b32.xlu0 %v749_v39, %s663_s30  ;;  %s679_s30 = smov 24   ;;  %s680_s5 = smov 22  }
 0x198   :  { %225 = vrot.lane.b32.xlu1 %v749_v39, %s667_s7  ;;  %221 = vrot.lane.b32.xlu0 %v749_v39, %s666_s6  ;;  %s681_s6 = smov 28   ;;  %s682_s7 = smov 26  }
 0x19c   :  { %229 = vrot.lane.b32.xlu0 %v749_v39, %s668_s10  ;;  %s797_s10 = sld [smem:[#allocation2 + $0xc]] }
 0x1f2   :  { %v178_v40 = vpop.permute.xlu1 %177  ;;  %v174_v41 = vpop.permute.xlu0 %173 }
 0x1f3   :  { %v176_v42 = vadd.f32 %v174_v41, %v749_v39 }
 0x1f5   :  { %v180_v43 = vadd.f32 %v178_v40, %v176_v42 }
 0x1f6   :  { %v186_v44 = vpop.permute.xlu1 %185  ;;  %v182_v45 = vpop.permute.xlu0 %181 }
 0x1f7   :  { %v184_v46 = vadd.f32 %v182_v45, %v180_v43 }
 0x1f9   :  { %v188_v47 = vadd.f32 %v186_v44, %v184_v46 }
 0x1fa   :  { %v194_v48 = vpop.permute.xlu1 %193  ;;  %v190_v49 = vpop.permute.xlu0 %189 }
 0x1fb   :  { %v192_v50 = vadd.f32 %v190_v49, %v188_v47 }
 0x1fd   :  { %v196_v51 = vadd.f32 %v194_v48, %v192_v50 }
 0x1fe   :  { %v202_v52 = vpop.permute.xlu1 %201  ;;  %v198_v53 = vpop.permute.xlu0 %197 }
 0x1ff   :  { %v200_v54 = vadd.f32 %v198_v53, %v196_v51 }
 0x201   :  { %v204_v55 = vadd.f32 %v202_v52, %v200_v54 }
 0x202   :  { %v210_v56 = vpop.permute.xlu1 %209  ;;  %v206_v57 = vpop.permute.xlu0 %205 }
 0x203   :  { %v208_v58 = vadd.f32 %v206_v57, %v204_v55 }
 0x205   :  { %v212_v59 = vadd.f32 %v210_v56, %v208_v58 }
 0x206   :  { %v218_v60 = vpop.permute.xlu1 %217  ;;  %v214_v61 = vpop.permute.xlu0 %213 }
 0x207   :  { %v216_v62 = vadd.f32 %v214_v61, %v212_v59 }
 0x209   :  { %v220_v63 = vadd.f32 %v218_v60, %v216_v62 }
 0x20a   :  { %v222_v0 = vpop.permute.xlu0 %221  ;;  %v226_v2 = vpop.permute.xlu1 %225 }
 0x20b   :  { %v224_v1 = vadd.f32 %v222_v0, %v220_v63 }
 0x20d   :  { %v228_v3 = vadd.f32 %v226_v2, %v224_v1 }
 0x20e   :  { %v230_v4 = vpop.permute.xlu0 %229 }
 0x20f   :  { %v232_v5 = vadd.f32 %v230_v4, %v228_v3 }
 0x211   :  { %v233_v6 = vmul.f32 0.0625, %v232_v5 }
 0x213   :  { %v235_v9 = vrot.slane %v233_v6, 7  ;;  %v239_v10 = vrot.slane %v233_v6, 1  ;;  %v248_v15 = vmul.f32 %v247_v8, %v233_v6 }
 0x215   :  { %v238_v12 = vsel %vm237_vm4, 0.0, %v235_v9  ;;  %v242_v13 = vsel %vm241_vm5, %v239_v10, 0.0  ;;  %vm335_vm4 = vcmask 244736   ;;  %vm338_vm5 = vcmask 257024  }
 0x216   :  { %v245_v14 = vmul.f32 %v244_v7, %v238_v12  ;;  %v252_v17 = vmul.f32 %v251_v11, %v242_v13  ;;  %v391_v9 = vstv %s519_s9  ;;  %v388_v12 = vstv %s518_s2 }
 0x217   :  { %v376_v13 = vstv %s516_s11 }
 0x218   :  { %v249_v16 = vadd.f32 %v248_v15, %v245_v14  ;;  %v379_v14 = vstv %s797_s10 }
 0x21a   :  { %v253_v19 = vadd.f32 %v252_v17, %v249_v16  ;;  %v369_v16 = vstv %s799_s1  ;;  %v372_v17 = vstv %s801_s12 }
 0x21c   :  { %v256_v20 = vadd.f32 %v255_v18, %v253_v19  ;;  %v412_v19 = vstv %s803_s13 }
 0x21e   :  { %v257_v21 = vmul.f32 0.5, %v256_v20  ;;  %v400_v20 = vstv %s805_s14 }
 0x220   :  { %607 = vtanh.f32 %v257_v21 }
 0x22a   :  { %v608_v22 = vpop.eup %607 }
 0x22b   :  { %v259_v23 = vadd.f32 1.0, %v608_v22 }
 0x22d   :  { %v260_v24 = vmul.f32 0.5, %v259_v23 }
 0x22f   :  { %265 = vrot.lane.b32.xlu0 %v260_v24, %s669_s15  ;;  %262 = vrot.lane.b32.xlu1 %v260_v24, %s670_s16  ;;  %s807_s15 = sld [smem:[#allocation2 + $0xf]]  ;;  %s809_s16 = sld [smem:[#allocation2 + $0xe]] }
 0x233   :  { %271 = vrot.lane.b32.xlu0 %v260_v24, %s671_s17  ;;  %268 = vrot.lane.b32.xlu1 %v260_v24, %s672_s18  ;;  %s811_s17 = sld [smem:[#allocation2 + $0xa]] }
 0x237   :  { %277 = vrot.lane.b32.xlu0 %v260_v24, %s673_s19  ;;  %274 = vrot.lane.b32.xlu1 %v260_v24, %s674_s20  ;;  %s818_s19 = sld [smem:[#allocation2 + $0x11]]  ;;  %s820_s20 = sld [smem:[#allocation2 + $0x10]] }
 0x23b   :  { %283 = vrot.lane.b32.xlu0 %v260_v24, %s675_s21  ;;  %280 = vrot.lane.b32.xlu1 %v260_v24, %s676_s27  ;;  %s528_s21 = sld [smem:[#allocation2 + $0x12]] }
 0x23f   :  { %289 = vrot.lane.b32.xlu0 %v260_v24, %s677_s28  ;;  %286 = vrot.lane.b32.xlu1 %v260_v24, %s678_s29 }
 0x243   :  { %295 = vrot.lane.b32.xlu0 %v260_v24, %s679_s30  ;;  %292 = vrot.lane.b32.xlu1 %v260_v24, %s680_s5 }
 0x247   :  { %301 = vrot.lane.b32.xlu0 %v260_v24, %s681_s6  ;;  %298 = vrot.lane.b32.xlu1 %v260_v24, %s682_s7 }
 0x24b   :  { %304 = vrot.lane.b32.xlu1 %v260_v24, %s683_s8 }
 0x2a1   :  { %v266_v25 = vpop.permute.xlu0 %265  ;;  %v263_v26 = vpop.permute.xlu1 %262 }
 0x2a2   :  { %v308_v27 = vsel %vm307_vm6, %v260_v24, %v263_v26  ;;  %v403_v26 = vstv %s809_s16 }
 0x2a3   :  { %v310_v29 = vsel %vm309_vm7, %v308_v27, %v266_v25  ;;  %v415_v25 = vstv %s807_s15 }
 0x2a5   :  { %v272_v28 = vpop.permute.xlu0 %271  ;;  %v269_v30 = vpop.permute.xlu1 %268 }
 0x2a6   :  { %v312_v31 = vsel %vm311_vm8, %v310_v29, %v269_v30 }
 0x2a7   :  { %v314_v33 = vsel %vm313_vm9, %v312_v31, %v272_v28 }
 0x2a9   :  { %v278_v32 = vpop.permute.xlu0 %277  ;;  %v275_v34 = vpop.permute.xlu1 %274 }
 0x2aa   :  { %v316_v35 = vsel %vm315_vm10, %v314_v33, %v275_v34  ;;  %v436_v33 = vstv %s811_s17 }
 0x2ab   :  { %v318_v37 = vsel %vm317_vm11, %v316_v35, %v278_v32 }
 0x2ad   :  { %v284_v36 = vpop.permute.xlu0 %283  ;;  %v281_v38 = vpop.permute.xlu1 %280 }
 0x2ae   :  { %v320_v40 = vsel %vm319_vm12, %v318_v37, %v281_v38  ;;  %v439_v38 = vstv %s818_s19 }
 0x2af   :  { %v322_v42 = vsel %vm321_vm13, %v320_v40, %v284_v36  ;;  %vm360_vm13 = vcmask 310272   ;;  %v427_v40 = vstv %s820_s20 }
 0x2b1   :  { %v290_v41 = vpop.permute.xlu0 %289  ;;  %v287_v43 = vpop.permute.xlu1 %286 }
 0x2b2   :  { %v324_v44 = vsel %vm323_vm14, %v322_v42, %v287_v43  ;;  %vm493_vm14 = vcmask 125952  }
 0x2b3   :  { %v326_v46 = vsel %vm325_vm15, %v324_v44, %v290_v41 }
 0x2b5   :  { %v296_v45 = vpop.permute.xlu0 %295  ;;  %v293_v47 = vpop.permute.xlu1 %292 }
 0x2b6   :  { %v328_v48 = vsel %vm327_vm0, %v326_v46, %v293_v47 }
 0x2b7   :  { %v330_v49 = vsel %vm329_vm1, %v328_v48, %v296_v45 }
 0x2b9   :  { %v299_v50 = vpop.permute.xlu1 %298  ;;  %v302_v51 = vpop.permute.xlu0 %301 }
 0x2ba   :  { %v332_v52 = vsel %vm331_vm2, %v330_v49, %v299_v50 }
 0x2bb   :  { %v334_v53 = vsel %vm333_vm3, %v332_v52, %v302_v51 }
 0x2bd   :  { %v305_v54 = vpop.permute.xlu1 %304 }
 0x2be   :  { %v336_v55 = vsel %vm335_vm4, %v334_v53, %v305_v54 }
 0x2bf   :  { %v791_v56 = vmul.f32 %v336_v55, %v749_v39 }
 0x2c1   :  { %v339_v57 = vsel %vm338_vm5, %v791_v56, 0.0  ;;  %v348_v58 = vsel %vm338_vm5, %v791_v56, -inf }
 0x2c2   :  { %v340_v59 = vrot.slane %v339_v57, 4  ;;  %v349_v60 = vrot.slane %v348_v58, 4 }
 0x2c4   :  { %v341_v61 = vadd.f32 %v340_v59, %v339_v57  ;;  %v350_v62 = vmax.f32 %v348_v58, %v349_v60 }
 0x2c6   :  { %v351_v63 = vrot.slane %v350_v62, 2  ;;  %v342_v0 = vrot.slane %v341_v61, 2 }
 0x2c8   :  { %v352_v1 = vmax.f32 %v350_v62, %v351_v63  ;;  %v343_v2 = vadd.f32 %v342_v0, %v341_v61  ;;  %v448_v61 = vstv %s528_s21 }
 0x2ca   :  { %v353_v3 = vrot.slane %v352_v1, 1  ;;  %v344_v4 = vrot.slane %v343_v2, 1 }
 0x2cc   :  { %v354_v5 = vmax.f32 %v352_v1, %v353_v3  ;;  %v345_v6 = vadd.f32 %v344_v4, %v343_v2  ;;  %v454_v1 = vlaneseq }
 0x2ce   :  { %363 = vrot.lane.b32.xlu1 %v354_v5, %s672_s18  ;;  %v347_v39 = vmul.f32 0.25, %v345_v6  ;;  %v455_v2 = vshrl.u32 %v454_v1, 7 }
 0x2d0   :  { %356 = vrot.lane.b32.xlu0 %v347_v39, %s672_s18  ;;  %s813_s18 = sld [smem:[#allocation2 + $0x9]]  ;;  %v456_v5 = vsub.s32 0, %v455_v2 }
 0x2d6   :  { %v424_v34 = vstv %s813_s18 }
 0x340   :  { %v364_v7 = vpop.permute.xlu1 %363 }
 0x341   :  { %v366_v8 = vsel %vm311_vm8, 0.0, %v364_v7 }
 0x342   :  { %v367_v10 = vsel %vm360_vm13, %v366_v8, 0.0  ;;  %v357_v11 = vpop.permute.xlu0 %356 }
 0x343   :  { %v359_v15 = vsel %vm311_vm8, 0.0, %v357_v11  ;;  %v392_v22 = vmul.f32 %v391_v9, %v367_v10  ;;  %v380_v24 = vmul.f32 %v379_v14, %v367_v10  ;;  %v373_v27 = vmul.f32 %v372_v17, %v367_v10 }
 0x344   :  { %v361_v18 = vsel %vm360_vm13, %v359_v15, 0.0  ;;  %v416_v36 = vmul.f32 %v415_v25, %v367_v10  ;;  %v404_v37 = vmul.f32 %v403_v26, %v367_v10  ;;  %v440_v45 = vmul.f32 %v439_v38, %v367_v10 }
 0x345   :  { %v389_v21 = vmul.f32 %v388_v12, %v361_v18  ;;  %v377_v23 = vmul.f32 %v376_v13, %v361_v18  ;;  %v370_v28 = vmul.f32 %v369_v16, %v361_v18  ;;  %v413_v31 = vmul.f32 %v412_v19, %v361_v18 }
 0x346   :  { %v401_v32 = vmul.f32 %v400_v20, %v361_v18  ;;  %v437_v43 = vmul.f32 %v436_v33, %v361_v18  ;;  %v425_v44 = vmul.f32 %v424_v34, %v361_v18  ;;  %v428_v46 = vmul.f32 %v427_v40, %v367_v10 }
 0x347   :  { %v393_v29 = vadd.f32 %v392_v22, %v389_v21  ;;  %v381_v30 = vadd.f32 %v380_v24, %v377_v23  ;;  %v374_v35 = vadd.f32 %v373_v27, %v370_v28  ;;  %v417_v41 = vadd.f32 %v416_v36, %v413_v31 }
 0x348   :  { %v405_v42 = vadd.f32 %v404_v37, %v401_v32  ;;  %v441_v47 = vadd.f32 %v440_v45, %v437_v43  ;;  %v429_v48 = vadd.f32 %v428_v46, %v425_v44 }
 0x349   :  { %395 = vrot.lane.b32.xlu1 %v393_v29, %s653_s23  ;;  %383 = vrot.lane.b32.xlu0 %v381_v30, %s651_s3 }
 0x34d   :  { %419 = vrot.lane.b32.xlu1 %v417_v41, %s654_s24  ;;  %407 = vrot.lane.b32.xlu0 %v405_v42, %s652_s22 }
 0x351   :  { %443 = vrot.lane.b32.xlu1 %v441_v47, %s656_s0  ;;  %431 = vrot.lane.b32.xlu0 %v429_v48, %s655_s25 }
 0x3bb   :  { %v396_v49 = vpop.permute.xlu1 %395  ;;  %v384_v50 = vpop.permute.xlu0 %383 }
 0x3bc   :  { %v386_v51 = vadd.f32 %v384_v50, %v374_v35 }
 0x3be   :  { %v398_v52 = vadd.f32 %v396_v49, %v386_v51 }
 0x3bf   :  { %v420_v53 = vpop.permute.xlu1 %419  ;;  %v408_v54 = vpop.permute.xlu0 %407 }
 0x3c0   :  { %v410_v55 = vadd.f32 %v408_v54, %v398_v52 }
 0x3c2   :  { %v422_v57 = vadd.f32 %v420_v53, %v410_v55 }
 0x3c3   :  { %v432_v58 = vpop.permute.xlu0 %431  ;;  %v444_v60 = vpop.permute.xlu1 %443 }
 0x3c4   :  { %v434_v59 = vadd.f32 %v432_v58, %v422_v57 }
 0x3c6   :  { %v446_v62 = vadd.f32 %v444_v60, %v434_v59 }
 0x3c8   :  { %v449_v63 = vadd.f32 %v448_v61, %v446_v62 }
 0x3ca   :  { %v450_v0 = vmul.f32 0.5, %v449_v63 }
 0x3cc   :  { %609 = vtanh.f32 %v450_v0 }
 0x3d6   :  { %v610_v3 = vpop.eup %609 }
 0x3d7   :  { %v452_v4 = vadd.f32 1.0, %v610_v3 }
 0x3d9   :  { %v453_v6 = vmul.f32 0.5, %v452_v4 }
 0x3db   :  { %v457_v39 = vrot.slane %v453_v6, %v456_v5 }
 0x3dd   :  { %v458_v7 = vmul.f32 %v457_v39, %v791_v56 }
 0x3df   :  { %460 = vrot.lane.b32.xlu0 %v458_v7, %s651_s3 }
 0x451   :  { %v461_v8 = vpop.permute.xlu0 %460 }
 0x452   :  { %v463_v9 = vmax.f32 %v458_v7, %v461_v8 }
 0x454   :  { %468 = vrot.lane.b32.xlu0 %v463_v9, %s653_s23  ;;  %465 = vrot.lane.b32.xlu1 %v463_v9, %s651_s3  ;;  %s684_s3 = smov [#allocation5]  }
 0x458   :  { %474 = vrot.lane.b32.xlu0 %v463_v9, %s654_s24  ;;  %471 = vrot.lane.b32.xlu1 %v463_v9, %s652_s22  ;;  %s501_s22 = sshll.u32 %s684_s3, 4  ;;  %s502_s22 = int_to_ptr.vmem [resolvable:$true] %s501_s22 }
 0x459   :  { %s623_s23 = scalar_lea.vmem %s502_s22, 64  ;;  %p628_p6 = scmp.lt.s32.totalorder %s502_s22, %s502_s22 }
 0x45a   :  { %p624_p5 = scmp.ne.s32.totalorder %s502_s22, %s623_s23  ;;  %p629_p7 = scmp.lt.s32.totalorder %s623_s23, %s623_s23 }
 0x45c   :  { %480 = vrot.lane.b32.xlu0 %v463_v9, %s656_s0  ;;  %477 = vrot.lane.b32.xlu1 %v463_v9, %s655_s25  ;;  %p630_p8 = por %p629_p7, %p628_p6 }
 0x45e   :  { %p631_p9 = pnand %p630_p8, %p624_p5 }
 0x460   :  { %483 = vrot.lane.b32.xlu1 %v463_v9, %s657_s26 }
 0x4c6   :  { %v469_v10 = vpop.permute.xlu0 %468  ;;  %v466_v56 = vpop.permute.xlu1 %465 }
 0x4c7   :  { %v486_v11 = vsel %vm307_vm6, %v463_v9, %v466_v56 }
 0x4c8   :  { %v487_v13 = vsel %vm309_vm7, %v486_v11, %v469_v10 }
 0x4ca   :  { %v475_v12 = vpop.permute.xlu0 %474  ;;  %v472_v14 = vpop.permute.xlu1 %471 }
 0x4cb   :  { %v488_v15 = vsel %vm311_vm8, %v487_v13, %v472_v14 }
 0x4cc   :  { %v489_v16 = vsel %vm313_vm9, %v488_v15, %v475_v12 }
 0x4ce   :  { %v478_v17 = vpop.permute.xlu1 %477  ;;  %v481_v18 = vpop.permute.xlu0 %480 }
 0x4cf   :  { %v490_v19 = vsel %vm315_vm10, %v489_v16, %v478_v17 }
 0x4d0   :  { %v491_v21 = vsel %vm317_vm11, %v490_v19, %v481_v18 }
 0x4d2   :  { %v484_v20 = vpop.permute.xlu1 %483 }
 0x4d3   :  { %v492_v22 = vsel %vm319_vm12, %v491_v21, %v484_v20 }
 0x4d4   :  { %494 = vst.msk [vmem:[#allocation5] sm:$0xf] %vm493_vm14, %v492_v22 }
 0x4d5   :  { %634 = shalt.err (!%p631_p9)
}
 0x4d6   :  { %s635_s0 = scalar_lea.hbm %s872_s4, 64 }
 0x4d7   :  { %p636_p10 = scmp.ne.s32.totalorder %s872_s4, %s635_s0  ;;  %p639_p11 = scmp.lt.u32.totalorder %s635_s0, %s872_s4 }
 0x4d9   :  { %p641_p12 = pnand %p639_p11, %p636_p10 }
 0x4db   :  { %644 = shalt.err (!%p641_p12)
}
 0x4dc   :  { %504 = dma.vmem_to_hbm [thread:$0]  %s502_s22, 64, %s872_s4, [#allocation3]  }
 0x4dd   :  { %647 = dma.done.wait [#allocation3], 64  }
 0x4de   :  { %648 = vsyncadd [#allocation3], 4294967232 }
 0x4df   :  { %508 = vsyncpa [#allocation3], 1 }
 0x4e0   :  { %509 = vsyncpa [#allocation4], 1 }

</bundles_post_ra>
